<compile_context>
chip_gen: v6e
topology: v6e:2x2x1
jax: 0.10.0
libtpu: 0.0.40
codegen_flags: <defaults>
</compile_context>

<pallas_src>
import functools

import jax
import jax.numpy as jnp
from jax.experimental import pallas as pl
from jax.experimental.pallas import tpu as pltpu

_SUBLANE = 8  # f32 sublane count


def _round_up(x, m):
    return ((x + m - 1) // m) * m


def _choose_batch_tile(padded_batch, block_batch):
    """Largest multiple-of-8 tile that divides padded_batch, is <= block_batch,
    and (when possible) leaves >= 2 grid steps for v7x megacore sharding."""
    q = padded_batch // _SUBLANE                     # work in units of 8 rows
    cap = max(_SUBLANE, (min(block_batch, padded_batch) // _SUBLANE) * _SUBLANE)
    d = cap // _SUBLANE
    if q > 1:                                        # keep >= 2 grid steps
        d = min(d, (q + 1) // 2)
    d = max(d, 1)
    while q % d != 0:                                # largest divisor of q <= d
        d -= 1
    return _SUBLANE * d


def _actor_kernel(s_ref, w1_ref, b1_ref, w2_ref, b2_ref, w3_ref, b3_ref, out_ref):
    # fc1 + relu
    h1 = jnp.dot(s_ref[...], w1_ref[...], preferred_element_type=jnp.float32) + b1_ref[...]
    h1 = jnp.maximum(h1, 0.0)
    # fc2 + relu
    h2 = jnp.dot(h1, w2_ref[...], preferred_element_type=jnp.float32) + b2_ref[...]
    h2 = jnp.maximum(h2, 0.0)
    # pi head + softmax over dim=1 (actions). Exact division: free in this
    # memory-bound regime and keeps row sums == 1 to f32 rounding.
    logits = jnp.dot(h2, w3_ref[...], preferred_element_type=jnp.float32) + b3_ref[...]
    m = jnp.max(logits, axis=-1, keepdims=True)
    e = jnp.exp(logits - m)
    denom = jnp.sum(e, axis=-1, keepdims=True)
    out_ref[...] = (e / denom).astype(out_ref.dtype)


@functools.partial(jax.jit, static_argnames=("block_batch",))
def actor_forward(state, w1, b1, w2, b2, w3, b3, *, block_batch=4096):
    batch, actor_dims = state.shape
    h1_dim = w1.shape[1]
    h2_dim = w2.shape[1]
    n_actions = w3.shape[1]

    # Pad the batch only up to a multiple of 8 (sublane); no tile-sized padding.
    padded_batch = _round_up(batch, _SUBLANE)
    state_p = state
    if padded_batch != batch:
        state_p = jnp.pad(state, ((0, padded_batch - batch), (0, 0)))

    tb = _choose_batch_tile(padded_batch, block_batch)
    grid = (padded_batch // tb,)

    resident = lambda i: (0, 0)  # weights/biases pinned in VMEM across steps

    flops = 2 * padded_batch * (actor_dims * h1_dim + h1_dim * h2_dim + h2_dim * n_actions)
    bytes_accessed = 4 * (
        padded_batch * (actor_dims + n_actions)
        + actor_dims * h1_dim + h1_dim
        + h1_dim * h2_dim + h2_dim
        + h2_dim * n_actions + n_actions)

    out = pl.pallas_call(
        _actor_kernel,
        out_shape=jax.ShapeDtypeStruct((padded_batch, n_actions), jnp.float32),
        grid=grid,
        in_specs=[
            pl.BlockSpec((tb, actor_dims), lambda i: (i, 0)),   # state tile (pipelined)
            pl.BlockSpec((actor_dims, h1_dim), resident),       # w1
            pl.BlockSpec((1, h1_dim), resident),                # b1
            pl.BlockSpec((h1_dim, h2_dim), resident),           # w2
            pl.BlockSpec((1, h2_dim), resident),                # b2
            pl.BlockSpec((h2_dim, n_actions), resident),        # w3 (true width)
            pl.BlockSpec((1, n_actions), resident),             # b3 (true width)
        ],
        # Last block dim == full array dim (n_actions), so no 128-lane padding
        # is written back to HBM.
        out_specs=pl.BlockSpec((tb, n_actions), lambda i: (i, 0)),
        compiler_params=pltpu.CompilerParams(
            dimension_semantics=("parallel",),      # megacore shard on v7x
            vmem_limit_bytes=32 * 1024 * 1024,      # safe within v7x scoped VMEM
        ),
        cost_estimate=pl.CostEstimate(
            flops=flops,
            transcendentals=padded_batch * n_actions,  # exp
            bytes_accessed=bytes_accessed,
        ),
    )(state_p, w1, b1, w2, b2, w3, b3)

    if padded_batch != batch:
        out = out[:batch]
    return out


def _orthogonal(key, shape, std=1.0, dtype=jnp.float32):
    # Mirrors nn.init.orthogonal_(weight, std) for a [out, in] weight matrix.
    rows, cols = shape
    n = max(rows, cols)
    a = jax.random.normal(key, (n, n), dtype=jnp.float32)
    q, r = jnp.linalg.qr(a)
    q = q * jnp.sign(jnp.diag(r))
    return (std * q[:rows, :cols]).astype(dtype)


def init_actor_params(key, actor_dims, n_hiddens_1, n_hiddens_2, n_actions,
                      bias_const=1e-6):
    # TODO(synk): checkpoint save/load and the Adam optimizer from the PyTorch
    # module are host-side bookkeeping, not part of the forward kernel.
    k1, k2, k3 = jax.random.split(key, 3)
    # PyTorch Linear weight is [out, in]; transpose to [in, out] for x @ W.
    w1 = _orthogonal(k1, (n_hiddens_1, actor_dims)).T
    w2 = _orthogonal(k2, (n_hiddens_2, n_hiddens_1)).T
    w3 = _orthogonal(k3, (n_actions, n_hiddens_2)).T
    # Biases kept 2-D [1, out] so they live cleanly on the (sublane, lane) grid.
    b1 = jnp.full((1, n_hiddens_1), bias_const, jnp.float32)
    b2 = jnp.full((1, n_hiddens_2), bias_const, jnp.float32)
    b3 = jnp.full((1, n_actions), bias_const, jnp.float32)
    return w1, b1, w2, b2, w3, b3


def reference_forward(state, w1, b1, w2, b2, w3, b3):
    h1 = jnp.maximum(state @ w1 + b1, 0.0)
    h2 = jnp.maximum(h1 @ w2 + b2, 0.0)
    logits = h2 @ w3 + b3
    return jax.nn.softmax(logits, axis=1)


if __name__ == "__main__":
    # Small shapes consistent with the module's forward:
    #   state: [batch, actor_dims] -> output: [batch, n_actions]
    batch, actor_dims = 4, 16
    n_hiddens_1, n_hiddens_2, n_actions = 32, 32, 8

    key = jax.random.PRNGKey(0)
    k_state, k_params = jax.random.split(key)
    state = jax.random.normal(k_state, (batch, actor_dims), dtype=jnp.float32)
    params = init_actor_params(k_params, actor_dims, n_hiddens_1, n_hiddens_2,
                               n_actions)

    pi = actor_forward(state, *params)
    pi = jax.block_until_ready(pi)

    ref = reference_forward(state, *params)
    assert pi.shape == (batch, n_actions)
    assert jnp.allclose(pi, ref, atol=1e-4, rtol=1e-4)
    assert jnp.allclose(jnp.sum(pi, axis=1), jnp.ones((batch,)), atol=1e-5)

    # Second check: non-multiple-of-8 batch with multiple grid steps.
    state2 = jax.random.normal(jax.random.PRNGKey(1), (20, actor_dims),
                               dtype=jnp.float32)
    pi2 = jax.block_until_ready(actor_forward(state2, *params, block_batch=8))
    ref2 = reference_forward(state2, *params)
    assert pi2.shape == (20, n_actions)
    assert jnp.allclose(pi2, ref2, atol=1e-4, rtol=1e-4)
    assert jnp.allclose(jnp.sum(pi2, axis=1), jnp.ones((20,)), atol=1e-5)

    print("KERNEL_OK")
</pallas_src>

<mosaic_0001>
module attributes {stable_mosaic.version = 11 : i64} {
  func.func @_actor_kernel(%arg0: i32, %arg1: memref<8x16xf32, #tpu.memory_space<vmem>>, %arg2: memref<16x32xf32, #tpu.memory_space<vmem>>, %arg3: memref<1x32xf32, #tpu.memory_space<vmem>>, %arg4: memref<32x32xf32, #tpu.memory_space<vmem>>, %arg5: memref<1x32xf32, #tpu.memory_space<vmem>>, %arg6: memref<32x8xf32, #tpu.memory_space<vmem>>, %arg7: memref<1x8xf32, #tpu.memory_space<vmem>>, %arg8: memref<8x8xf32, #tpu.memory_space<vmem>>) attributes {dimension_semantics = [#tpu.dimension_semantics<parallel>], iteration_bounds = array<i64: 1>, scalar_prefetch = 0 : i64, scratch_operands = 0 : i64, tpu.core_type = #tpu.core_type<tc>, window_params = [{transform_indices = @transform_0, window_bounds = array<i64: 8, 16>}, {pipeline_mode = #tpu.pipeline_mode<synchronous>, transform_indices = @transform_1, window_bounds = array<i64: 16, 32>}, {pipeline_mode = #tpu.pipeline_mode<synchronous>, transform_indices = @transform_2, window_bounds = array<i64: 1, 32>}, {pipeline_mode = #tpu.pipeline_mode<synchronous>, transform_indices = @transform_3, window_bounds = array<i64: 32, 32>}, {pipeline_mode = #tpu.pipeline_mode<synchronous>, transform_indices = @transform_4, window_bounds = array<i64: 1, 32>}, {pipeline_mode = #tpu.pipeline_mode<synchronous>, transform_indices = @transform_5, window_bounds = array<i64: 32, 8>}, {pipeline_mode = #tpu.pipeline_mode<synchronous>, transform_indices = @transform_6, window_bounds = array<i64: 1, 8>}, {transform_indices = @transform_7, window_bounds = array<i64: 8, 8>}]} {
    %c0 = arith.constant 0 : index
    %c0_0 = arith.constant 0 : index
    %0 = vector.load %arg1[%c0, %c0_0] : memref<8x16xf32, #tpu.memory_space<vmem>>, vector<8x16xf32>
    %c0_1 = arith.constant 0 : index
    %c0_2 = arith.constant 0 : index
    %1 = vector.load %arg2[%c0_1, %c0_2] : memref<16x32xf32, #tpu.memory_space<vmem>>, vector<16x32xf32>
    %cst = arith.constant dense<0.000000e+00> : vector<8x32xf32>
    %2 = tpu.matmul %0, %1, %cst {dimension_numbers = #tpu.dot_dimension_numbers<[1], [0], [0], [1], [0, 0, 1, 1], [], []>} : vector<8x16xf32>, vector<16x32xf32>, vector<8x32xf32> -> vector<8x32xf32>
    %c0_3 = arith.constant 0 : index
    %c0_4 = arith.constant 0 : index
    %3 = vector.load %arg3[%c0_3, %c0_4] : memref<1x32xf32, #tpu.memory_space<vmem>>, vector<1x32xf32>
    %4 = vector.broadcast %3 : vector<1x32xf32> to vector<8x32xf32>
    %5 = arith.addf %2, %4 : vector<8x32xf32>
    %cst_5 = arith.constant 0.000000e+00 : f32
    %6 = vector.broadcast %cst_5 : f32 to vector<8x32xf32>
    %7 = arith.maximumf %5, %6 : vector<8x32xf32>
    %c0_6 = arith.constant 0 : index
    %c0_7 = arith.constant 0 : index
    %8 = vector.load %arg4[%c0_6, %c0_7] : memref<32x32xf32, #tpu.memory_space<vmem>>, vector<32x32xf32>
    %cst_8 = arith.constant dense<0.000000e+00> : vector<8x32xf32>
    %9 = tpu.matmul %7, %8, %cst_8 {dimension_numbers = #tpu.dot_dimension_numbers<[1], [0], [0], [1], [0, 0, 1, 1], [], []>} : vector<8x32xf32>, vector<32x32xf32>, vector<8x32xf32> -> vector<8x32xf32>
    %c0_9 = arith.constant 0 : index
    %c0_10 = arith.constant 0 : index
    %10 = vector.load %arg5[%c0_9, %c0_10] : memref<1x32xf32, #tpu.memory_space<vmem>>, vector<1x32xf32>
    %11 = vector.broadcast %10 : vector<1x32xf32> to vector<8x32xf32>
    %12 = arith.addf %9, %11 : vector<8x32xf32>
    %cst_11 = arith.constant 0.000000e+00 : f32
    %13 = vector.broadcast %cst_11 : f32 to vector<8x32xf32>
    %14 = arith.maximumf %12, %13 : vector<8x32xf32>
    %c0_12 = arith.constant 0 : index
    %c0_13 = arith.constant 0 : index
    %15 = vector.load %arg6[%c0_12, %c0_13] : memref<32x8xf32, #tpu.memory_space<vmem>>, vector<32x8xf32>
    %cst_14 = arith.constant dense<0.000000e+00> : vector<8x8xf32>
    %16 = tpu.matmul %14, %15, %cst_14 {dimension_numbers = #tpu.dot_dimension_numbers<[1], [0], [0], [1], [0, 0, 1, 1], [], []>} : vector<8x32xf32>, vector<32x8xf32>, vector<8x8xf32> -> vector<8x8xf32>
    %c0_15 = arith.constant 0 : index
    %c0_16 = arith.constant 0 : index
    %17 = vector.load %arg7[%c0_15, %c0_16] : memref<1x8xf32, #tpu.memory_space<vmem>>, vector<1x8xf32>
    %18 = vector.broadcast %17 : vector<1x8xf32> to vector<8x8xf32>
    %19 = arith.addf %16, %18 : vector<8x8xf32>
    %cst_17 = arith.constant dense<0xFF800000> : vector<8xf32>
    %20 = vector.multi_reduction <maximumf>, %19, %cst_17 [1] : vector<8x8xf32> to vector<8xf32>
    %21 = vector.shape_cast %20 : vector<8xf32> to vector<8x1xf32>
    %22 = vector.broadcast %21 : vector<8x1xf32> to vector<8x8xf32>
    %23 = arith.subf %19, %22 : vector<8x8xf32>
    %24 = math.exp %23 : vector<8x8xf32>
    %cst_18 = arith.constant dense<0.000000e+00> : vector<8xf32>
    %25 = vector.multi_reduction <add>, %24, %cst_18 [1] : vector<8x8xf32> to vector<8xf32>
    %26 = vector.shape_cast %25 : vector<8xf32> to vector<8x1xf32>
    %27 = vector.broadcast %26 : vector<8x1xf32> to vector<8x8xf32>
    %28 = arith.divf %24, %27 : vector<8x8xf32>
    %c0_19 = arith.constant 0 : index
    %c0_20 = arith.constant 0 : index
    %29 = vector.load %arg8[%c0_19, %c0_20] : memref<8x8xf32, #tpu.memory_space<vmem>>, vector<8x8xf32>
    tpu.vector_store %arg8[%c0_19, %c0_20], %28 {strides = array<i32>} : memref<8x8xf32, #tpu.memory_space<vmem>>, vector<8x8xf32>,
    return
  }
  func.func @transform_0(%arg0: i32) -> (i32, i32) {
    %c0_i32 = arith.constant 0 : i32
    %c0_i32_0 = arith.constant 0 : i32
    return %arg0, %c0_i32 : i32, i32
  }
  func.func @transform_1(%arg0: i32) -> (i32, i32) {
    %c0_i32 = arith.constant 0 : i32
    %c0_i32_0 = arith.constant 0 : i32
    %c0_i32_1 = arith.constant 0 : i32
    return %c0_i32, %c0_i32_0 : i32, i32
  }
  func.func @transform_2(%arg0: i32) -> (i32, i32) {
    %c0_i32 = arith.constant 0 : i32
    %c0_i32_0 = arith.constant 0 : i32
    %c0_i32_1 = arith.constant 0 : i32
    return %c0_i32, %c0_i32_0 : i32, i32
  }
  func.func @transform_3(%arg0: i32) -> (i32, i32) {
    %c0_i32 = arith.constant 0 : i32
    %c0_i32_0 = arith.constant 0 : i32
    %c0_i32_1 = arith.constant 0 : i32
    return %c0_i32, %c0_i32_0 : i32, i32
  }
  func.func @transform_4(%arg0: i32) -> (i32, i32) {
    %c0_i32 = arith.constant 0 : i32
    %c0_i32_0 = arith.constant 0 : i32
    %c0_i32_1 = arith.constant 0 : i32
    return %c0_i32, %c0_i32_0 : i32, i32
  }
  func.func @transform_5(%arg0: i32) -> (i32, i32) {
    %c0_i32 = arith.constant 0 : i32
    %c0_i32_0 = arith.constant 0 : i32
    %c0_i32_1 = arith.constant 0 : i32
    return %c0_i32, %c0_i32_0 : i32, i32
  }
  func.func @transform_6(%arg0: i32) -> (i32, i32) {
    %c0_i32 = arith.constant 0 : i32
    %c0_i32_0 = arith.constant 0 : i32
    %c0_i32_1 = arith.constant 0 : i32
    return %c0_i32, %c0_i32_0 : i32, i32
  }
  func.func @transform_7(%arg0: i32) -> (i32, i32) {
    %c0_i32 = arith.constant 0 : i32
    %c0_i32_0 = arith.constant 0 : i32
    return %arg0, %c0_i32 : i32, i32
  }
}

</mosaic_0001>

<bundles_post_ra>
// kernel: actor_forward.1
= control target key start
LH: loop header
LB: loop body
LE: loop exit
PB: predicated region body
PF: predicated region fallthrough
CT: control target
= control target key end

     0   :  { %v352_v0 = vmov 0.0   ;;  %vm353_vm0 = vmmov 0   ;;  %vm36_vm1 = vcmask 130048   ;;  %vm122_vm2 = vcmask 261120   ;;  %s444_s1 = inlined_call_operand.vmem [shape: f32[16,32], index: 1, kind: input, shape index: {}]   ;;  %s445_s0 = inlined_call_operand.vmem [shape: f32[8,16], index: 0, kind: input, shape index: {}]   ;;  %s446_s3 = inlined_call_operand.vmem [shape: f32[32,32], index: 3, kind: input, shape index: {}]   ;;  %s447_s5 = inlined_call_operand.vmem [shape: f32[32,8], index: 5, kind: input, shape index: {}]   ;;  %s448_s2 = inlined_call_operand.vmem [shape: f32[1,32], index: 2, kind: input, shape index: {}]   ;;  %s449_s4 = inlined_call_operand.vmem [shape: f32[1,32], index: 4, kind: input, shape index: {}]   ;;  %s450_s6 = inlined_call_operand.vmem [shape: f32[1,8], index: 6, kind: input, shape index: {}]   ;;  %s451_s7 = inlined_call_operand.vmem [shape: f32[8,8], index: 7, kind: output, shape index: {}]  }
   0x1   :  { %317 = vmatprep.subr.mxu0 %v352_v0  ;;  %v28_v1 = vld [vmem:[%s444_s1 + $0x8] sm:$0xff]  ;;  %v27_v2 = vld [vmem:[%s444_s1] sm:$0xff]  ;;  %321 = vmatprep.mubr.msk.f32.mxu0 %vm353_vm0, %v352_v0  ;;  %v114_v4 = vld [vmem:[%s446_s3 + $0x18] sm:$0xff]  ;;  %vm281_vm3 = vcmask 64512  }
   0x2   :  { %318 = vmatpush3.msra.mxu0 %v28_v1  ;;  %v26_v3 = vld [vmem:[%s445_s0] sm:$0xff]  ;;  %324 = vmatprep.subr.mxu1 %v352_v0  ;;  %v113_v5 = vld [vmem:[%s446_s3 + $0x10] sm:$0xff]  ;;  %v112_v6 = vld [vmem:[%s446_s3 + $0x8] sm:$0xff] }
   0x3   :  { %319 = vmatprep.subr.mxu0 %v352_v0  ;;  %325 = vmatpush3.msra.mxu1 %v114_v4  ;;  %v111_v7 = vld [vmem:[%s446_s3] sm:$0xff]  ;;  %v200_v8 = vld [vmem:[%s447_s5 + $0x18] sm:$0xff]  ;;  %v199_v14 = vld [vmem:[%s447_s5 + $0x10] sm:$0xff] }
   0x4   :  { %320 = vmatpush3.msra.mxu0 %v27_v2  ;;  %326 = vmatprep.subr.mxu1 %v352_v0  ;;  %v298_v9 = vld [vmem:[%s448_s2] ss:$0 sm:$0xff]  ;;  %v198_v15 = vld [vmem:[%s447_s5 + $0x8] sm:$0xff] }
   0x5   :  { %322 = vmatmul.mubr.msk.f32.vlgmr.msra.gmra.mxu0 %vm36_vm1, %v26_v3  ;;  %332 = vmatprep.mubr.msk.f32.mxu1 %vm353_vm0, %v352_v0  ;;  %v197_v16 = vld [vmem:[%s447_s5] sm:$0xff] }
   0x6   :  { %335 = vmatprep.subr.mxu0 %v352_v0  ;;  %343 = vmatprep.mubr.msk.f32.mxu0 %vm353_vm0, %v352_v0  ;;  %v300_v17 = vld [vmem:[%s449_s4] ss:$0 sm:$0xff] }
   0x7   :  { %327 = vmatpush3.msra.mxu1 %v113_v5  ;;  %336 = vmatpush3.msra.mxu0 %v200_v8  ;;  %v302_v22 = vld [vmem:[%s450_s6] ss:$0 sm:$0xff] }
   0x8   :  { %328 = vmatprep.subr.mxu1 %v352_v0  ;;  %337 = vmatprep.subr.mxu0 %v352_v0 }
   0x9   :  { %329 = vmatpush3.msra.mxu1 %v112_v6  ;;  %338 = vmatpush3.msra.mxu0 %v199_v14 }
   0xa   :  { %330 = vmatprep.subr.mxu1 %v352_v0  ;;  %339 = vmatprep.subr.mxu0 %v352_v0 }
   0xb   :  { %331 = vmatpush3.msra.mxu1 %v111_v7  ;;  %340 = vmatpush3.msra.mxu0 %v198_v15 }
   0xc   :  { %341 = vmatprep.subr.mxu0 %v352_v0 }
   0xd   :  { %342 = vmatpush3.msra.mxu0 %v197_v16 }
  0xc5   :  { %v106_v10 = vpop.f32.mrf.mxu0 }
  0xc6   :  { %v107_v11 = vadd.f32 %v298_v9, %v106_v10 }
  0xc7   :  { %v323_v12 = vpop.f32.mrf.mxu0 }
  0xc8   :  { %v110_v13 = vmax.f32 %v107_v11, 0.0 }
  0xca   :  { %333 = vmatmul.mubr.msk.f32.vlgmr.msra.gmra.mxu1 %vm122_vm2, %v110_v13 }
 0x18a   :  { %v192_v18 = vpop.f32.mrf.mxu1 }
 0x18b   :  { %v193_v19 = vadd.f32 %v300_v17, %v192_v18 }
 0x18c   :  { %v334_v20 = vpop.f32.mrf.mxu1 }
 0x18d   :  { %v196_v21 = vmax.f32 %v193_v19, 0.0 }
 0x18f   :  { %344 = vmatmul.mubr.msk.f32.vlgmr.msra.gmra.mxu0 %vm122_vm2, %v196_v21 }
 0x24f   :  { %v277_v23 = vpop.f32.mrf.mxu0 }
 0x250   :  { %v278_v24 = vadd.f32 %v302_v22, %v277_v23 }
 0x251   :  { %v345_v25 = vpop.f32.mrf.mxu0 }
 0x252   :  { %v282_v26 = vsel %vm281_vm3, %v278_v24, -inf }
 0x253   :  { %283 = vmax.xlane.f32.xlu0 %v282_v26 }
 0x2dc   :  { %v284_v27 = vpop.xlane.xlu0 %283 }
 0x2dd   :  { %v285_v28 = vsub.f32 %v278_v24, %v284_v27 }
 0x2df   :  { %v286_v29 = vmul.f32 1.442695, %v285_v28 }
 0x2e1   :  { %348 = vpow2.f32 %v286_v29 }
 0x2ee   :  { %v349_v30 = vpop.eup %348 }
 0x2ef   :  { %v288_v31 = vsel %vm281_vm3, %v349_v30, 0.0 }
 0x2f0   :  { %289 = vadd.xlane.f32.xlu0 %v288_v31 }
 0x379   :  { %v290_v32 = vpop.xlane.xlu0 %289 }
 0x37a   :  { %350 = vrcp.f32 %v290_v32 }
 0x387   :  { %v351_v33 = vpop.eup %350 }
 0x388   :  { %v292_v34 = vmul.f32 %v351_v33, %v349_v30 }
 0x38a   :  { %293 = vst.msk [vmem:[%s451_s7] sm:$0xff] %vm281_vm3, %v292_v34 }

</bundles_post_ra>
